<compile_context>
chip_gen: v7x
topology: tpu7x:2x2x1
jax: 0.10.0
libtpu: 0.0.40
codegen_flags: <defaults>
</compile_context>

<pallas_src>
import functools

import jax
import jax.numpy as jnp
import numpy as np
from jax.experimental import pallas as pl
from jax.experimental.pallas import tpu as pltpu

LANES = 128      # vreg lane width
SUBLANES = 8     # f32 vreg sublane count


def _sublane_align(dtype) -> int:
    # Native tile second-minor size: 8 for 4-byte, 16 for 2-byte, 32 for 1-byte.
    itemsize = max(1, jnp.dtype(dtype).itemsize)
    return SUBLANES * max(1, 4 // itemsize)


def _partial_sum_kernel(x_ref, o_ref, *, block_rows, valid_rows, apply_mask):
    # x_ref: (block_rows, 128) block of the flattened input.
    # o_ref: (8, 128) f32 partial-sum slab owned by this grid step.
    x = x_ref[...].astype(jnp.float32)            # accumulate in f32
    if apply_mask:
        # Last grid block may extend past the (rows_aligned, 128) array; the
        # out-of-bounds rows are unspecified, so zero them (1 cmp+select per
        # vreg -- negligible vs. HBM-bound load).
        start = pl.program_id(0) * block_rows
        row_ids = jax.lax.broadcasted_iota(jnp.int32, x.shape, 0) + start
        x = jnp.where(row_ids < valid_rows, x, 0.0)
    groups = block_rows // SUBLANES
    # Collapse along the leading (sublane-group) axis only: pure VALU adds of
    # full (8,128) vregs, no cross-lane XLU work inside the kernel.
    o_ref[...] = jnp.sum(x.reshape(groups, SUBLANES, LANES), axis=0)


def sngen_loss(neg: jax.Array, weight: float = 1.0,
               block_rows: int = 2048) -> jax.Array:
    """-weight * mean(neg), computed with a Pallas TPU reduction kernel."""
    n = int(neg.size)
    align = _sublane_align(neg.dtype)
    flat = neg.reshape(-1)

    # Lane-dense 2D layout: (rows_aligned, 128) with rows_aligned a multiple
    # of the dtype's native sublane tile.  Only the minimal tail is padded
    # (zeros don't change the sum); already-aligned inputs are pad-free.
    rows = pl.cdiv(n, LANES)
    rows_aligned = pl.cdiv(rows, align) * align
    padded_n = rows_aligned * LANES
    if padded_n != n:
        flat = jnp.pad(flat, (0, padded_n - n))
    x2d = flat.reshape(rows_aligned, LANES)

    # Block rows: multiple of the sublane alignment, clamped to the array.
    block_rows = max(align, min(block_rows, rows_aligned))
    block_rows = pl.cdiv(block_rows, align) * align
    grid = pl.cdiv(rows_aligned, block_rows)
    apply_mask = (grid * block_rows) != rows_aligned   # last block overhangs?

    kernel = functools.partial(
        _partial_sum_kernel,
        block_rows=block_rows,
        valid_rows=rows_aligned,
        apply_mask=apply_mask,
    )

    partial_sums = pl.pallas_call(
        kernel,
        out_shape=jax.ShapeDtypeStruct((grid * SUBLANES, LANES), jnp.float32),
        grid_spec=pltpu.PrefetchScalarGridSpec(
            num_scalar_prefetch=0,
            grid=(grid,),
            in_specs=[pl.BlockSpec((block_rows, LANES), lambda i: (i, 0))],
            out_specs=pl.BlockSpec((SUBLANES, LANES), lambda i: (i, 0)),
        ),
        # Independent output slab per grid step -> "parallel": shards across
        # the 2 TensorCores on v7x; harmless on single-TC v5e/v6e.
        compiler_params=pltpu.CompilerParams(
            dimension_semantics=("parallel",)),
    )(x2d)

    # Tiny final reduce + scale on (grid*8, 128) f32 values (plain XLA).
    total = jnp.sum(partial_sums)
    loss = (-jnp.float32(weight)) * total / jnp.float32(n)
    return loss.astype(neg.dtype)


def _sngen_loss_reference(neg: jax.Array, weight: float = 1.0) -> jax.Array:
    return (-weight * jnp.mean(neg.astype(jnp.float32))).astype(neg.dtype)


if __name__ == "__main__":
    key = jax.random.PRNGKey(0)
    weight = 1.0

    # Primary run: small shape consistent with the module's forward.
    B, C, H, W = 2, 4, 16, 16
    neg = jax.random.normal(key, (B, C, H, W), dtype=jnp.float32)
    out = jax.block_until_ready(sngen_loss(neg, weight=weight))
    ref = _sngen_loss_reference(neg, weight=weight)
    np.testing.assert_allclose(np.asarray(out), np.asarray(ref),
                               rtol=1e-5, atol=1e-6)

    # Extra correctness check for the ragged / masked path (size not a
    # multiple of 1024) with a non-unit weight.
    neg2 = jax.random.normal(jax.random.PRNGKey(1), (3, 5, 7, 11),
                             dtype=jnp.float32)
    out2 = jax.block_until_ready(sngen_loss(neg2, weight=0.5))
    ref2 = _sngen_loss_reference(neg2, weight=0.5)
    np.testing.assert_allclose(np.asarray(out2), np.asarray(ref2),
                               rtol=1e-5, atol=1e-6)

    print("KERNEL_OK")
</pallas_src>

<mosaic_0001>
module attributes {stable_mosaic.version = 11 : i64} {
  func.func @_partial_sum_kernel(%arg0: i32, %arg1: memref<16x128xf32, #tpu.memory_space<vmem>>, %arg2: memref<8x128xf32, #tpu.memory_space<vmem>>) attributes {dimension_semantics = [#tpu.dimension_semantics<parallel>], iteration_bounds = array<i64: 1>, scalar_prefetch = 0 : i64, scratch_operands = 0 : i64, tpu.core_type = #tpu.core_type<tc>, window_params = [{transform_indices = @transform_0, window_bounds = array<i64: 16, 128>}, {transform_indices = @transform_1, window_bounds = array<i64: 8, 128>}]} {
    %c0 = arith.constant 0 : index
    %c0_0 = arith.constant 0 : index
    %0 = vector.load %arg1[%c0, %c0_0] : memref<16x128xf32, #tpu.memory_space<vmem>>, vector<16x128xf32>
    %1 = vector.shape_cast %0 : vector<16x128xf32> to vector<2x8x128xf32>
    %cst = arith.constant dense<0.000000e+00> : vector<8x128xf32>
    %2 = vector.multi_reduction <add>, %1, %cst [0] : vector<2x8x128xf32> to vector<8x128xf32>
    %c0_1 = arith.constant 0 : index
    %c0_2 = arith.constant 0 : index
    %3 = vector.load %arg2[%c0_1, %c0_2] : memref<8x128xf32, #tpu.memory_space<vmem>>, vector<8x128xf32>
    tpu.vector_store %arg2[%c0_1, %c0_2], %2 {strides = array<i32>} : memref<8x128xf32, #tpu.memory_space<vmem>>, vector<8x128xf32>,
    return
  }
  func.func @transform_0(%arg0: i32) -> (i32, i32) {
    %c0_i32 = arith.constant 0 : i32
    %c0_i32_0 = arith.constant 0 : i32
    return %arg0, %c0_i32 : i32, i32
  }
  func.func @transform_1(%arg0: i32) -> (i32, i32) {
    %c0_i32 = arith.constant 0 : i32
    %c0_i32_0 = arith.constant 0 : i32
    return %arg0, %c0_i32 : i32, i32
  }
}

</mosaic_0001>

<bundles_post_ra>
// kernel: tpu_custom_call.1
= control target key start
LH: loop header
LB: loop body
LE: loop exit
PB: predicated region body
PF: predicated region fallthrough
CT: control target
= control target key end

     0   :  { %6 = vsyncpa [#allocation3], 0  ;;  %s132_s0 = inlined_call_operand.hbm [shape: f32[16,128], index: 0, kind: input, shape index: {}]   ;;  %s133_s1 = inlined_call_operand.hbm [shape: f32[8,128], index: 1, kind: output, shape index: {}]  }
   0x1   :  { %7 = vsyncpa [#allocation4], 0  ;;  %s94_s6 = smov [#allocation2]   ;;  %s46_s10 = scalar_lea.hbm %s132_s0, 256 }
   0x2   :  { %s13_s7 = sshll.u32 %s94_s6, 4  ;;  %p47_p0 = scmp.ne.s32.totalorder %s132_s0, %s46_s10  ;;  %s14_s7 = int_to_ptr.vmem [resolvable:$true] %s13_s7 }
   0x3   :  { %p50_p1 = scmp.lt.u32.totalorder %s46_s10, %s132_s0 }
   0x5   :  { %p52_p2 = pnand %p50_p1, %p47_p0 }
   0x7   :  { %55 = shalt.err (!%p52_p2)
}
   0x8   :  { %s56_s15 = scalar_lea.vmem %s14_s7, 256  ;;  %p61_p4 = scmp.lt.s32.totalorder %s14_s7, %s14_s7 }
   0x9   :  { %p57_p3 = scmp.ne.s32.totalorder %s14_s7, %s56_s15  ;;  %p62_p5 = scmp.lt.s32.totalorder %s56_s15, %s56_s15 }
   0xb   :  { %p63_p6 = por %p62_p5, %p61_p4 }
   0xd   :  { %p64_p7 = pnand %p63_p6, %p57_p3 }
   0xf   :  { %67 = shalt.err (!%p64_p7)
}
  0x10   :  { %s95_s16 = smov 128   ;;  %s96_s17 = smov 8  }
  0x11   :  { %19 = dma.hbm_to_vmem [thread:$0]  %s132_s0, 256, %s14_s7, [#allocation3], %s95_s16, %s95_s16, %s96_s17  }
  0x12   :  { %90 = dma.done.wait [#allocation3], 256  }
  0x13   :  { %91 = vsyncadd [#allocation3], 4294967040  ;;  %s97_s20 = smov [#allocation5]   ;;  %v23_v0 = vld [vmem:[#allocation2] sm:$0xff]  ;;  %v24_v1 = vld [vmem:[#allocation2 + $0x8] sm:$0xff] }
  0x14   :  { %s33_s21 = sshll.u32 %s97_s20, 4  ;;  %v25_v2 = vadd.f32 %v24_v1, %v23_v0  ;;  %s34_s21 = int_to_ptr.vmem [resolvable:$true] %s33_s21 }
  0x15   :  { %s68_s22 = scalar_lea.vmem %s34_s21, 128  ;;  %p73_p9 = scmp.lt.s32.totalorder %s34_s21, %s34_s21 }
  0x16   :  { %26 = vst [vmem:[#allocation5] sm:$0xff] %v25_v2  ;;  %p69_p8 = scmp.ne.s32.totalorder %s34_s21, %s68_s22  ;;  %p74_p10 = scmp.lt.s32.totalorder %s68_s22, %s68_s22 }
  0x18   :  { %p75_p11 = por %p74_p10, %p73_p9 }
  0x1a   :  { %p76_p12 = pnand %p75_p11, %p69_p8 }
  0x1c   :  { %79 = shalt.err (!%p76_p12)
}
  0x1d   :  { %s80_s0 = scalar_lea.hbm %s133_s1, 128 }
  0x1e   :  { %p81_p13 = scmp.ne.s32.totalorder %s133_s1, %s80_s0  ;;  %p84_p0 = scmp.lt.u32.totalorder %s80_s0, %s133_s1 }
  0x20   :  { %p86_p1 = pnand %p84_p0, %p81_p13 }
  0x22   :  { %89 = shalt.err (!%p86_p1)
}
  0x23   :  { %36 = dma.vmem_to_hbm [thread:$0]  %s34_s21, 128, %s133_s1, [#allocation4]  }
  0x24   :  { %92 = dma.done.wait [#allocation4], 128  }
  0x25   :  { %93 = vsyncadd [#allocation4], 4294967168 }
  0x26   :  { %40 = vsyncpa [#allocation3], 1 }
  0x27   :  { %41 = vsyncpa [#allocation4], 1 }

</bundles_post_ra>
